<compile_context>
chip_gen: v7x
topology: tpu7x:2x2x1
jax: 0.10.0
libtpu: 0.0.40
codegen_flags: <defaults>
</compile_context>

<pallas_src>
import functools
import math

import jax
import jax.numpy as jnp
from jax.experimental import pallas as pl
from jax.experimental.pallas import tpu as pltpu

_LANE = 128      # last-dim tile (lanes)
_SUBLANE = 8     # second-to-last-dim tile (sublanes)
_DEFAULT_SCOPED_VMEM = 32 * 1024 * 1024   # conservative default scoped VMEM
_VMEM_CEILING = 64 * 1024 * 1024          # v7x physical per-TC VMEM


def _round_up(n, m):
    return ((n + m - 1) // m) * m


def _fused_mlp_kernel(*refs, num_layers, write_all):
    """Fused MLP forward for one (bm, F0p) batch block.

    refs = (x_ref, w1_ref, b1_ref, ..., wL_ref, bL_ref, out_refs...)
    All shapes are (8,128)-aligned f32; weights/biases are whole-array VMEM
    resident, x / outputs are M-blocked along the batch dim.
    tanh on every layer except the last (matches MyANN.forward).
    """
    x_ref = refs[0]
    out_refs = refs[1 + 2 * num_layers:]
    h = x_ref[...]
    for l in range(num_layers):
        w = refs[1 + 2 * l][...]
        b = refs[2 + 2 * l][...]
        # TODO(synk): optionally cast h/w to bf16 here (keep f32 accumulation)
        # for ~2-3x MXU throughput on v6e/v7x once layer widths are large
        # enough to be MXU-bound; pointless at 8/32/32/4 and loosens tolerance.
        y = jnp.dot(h, w, preferred_element_type=jnp.float32) + b  # (1,OUTp) bias broadcasts
        if l < num_layers - 1:
            y = jnp.tanh(y)
        if write_all:
            out_refs[l][...] = y.astype(out_refs[l].dtype)
        elif l == num_layers - 1:
            out_refs[0][...] = y.astype(out_refs[0].dtype)
        h = y


def pad_params(params):
    """Zero-pad each (w, b) to lane-aligned shapes.

    Call ONCE at init (or after each update_params) and reuse the result
    across forward calls — padding is hoisted out of the hot path. Zero
    padding is numerically inert (zero rows/cols contribute nothing,
    tanh(0)=0) and keeps in-kernel stores lane-dense.
    """
    padded = []
    for w, b in params:
        in_f, out_f = w.shape
        in_p = _round_up(in_f, _LANE)
        out_p = _round_up(out_f, _LANE)
        w_p = jnp.zeros((in_p, out_p), jnp.float32).at[:in_f, :out_f].set(w)
        b_p = jnp.zeros((1, out_p), jnp.float32).at[0, :out_f].set(b)
        padded.append((w_p, b_p))
    return padded


def make_my_ann_forward(layer_sizes, *, block_m=256, return_all=True):
    """Builds a jitted forward(x, padded_params) for a fixed layer-width list.

    return_all=True  -> returns (x_array, final) like MyANN.forward.
    return_all=False -> returns only the final layer output (skips L-1 DMAs).
    """
    num_layers = len(layer_sizes) - 1
    in_f = layer_sizes[0]
    in_pad = _round_up(in_f, _LANE)
    out_pads = [_round_up(o, _LANE) for o in layer_sizes[1:]]

    def _cost(batch):
        # Advisory cost from TRUE (unpadded) sizes.
        flops = sum(2 * batch * i * o
                    for i, o in zip(layer_sizes[:-1], layer_sizes[1:]))
        trans = sum(batch * o for o in layer_sizes[1:-1])
        param_elems = sum(i * o + o
                          for i, o in zip(layer_sizes[:-1], layer_sizes[1:]))
        out_elems = (sum(batch * o for o in layer_sizes[1:]) if return_all
                     else batch * layer_sizes[-1])
        bytes_accessed = 4 * (batch * in_f + param_elems + out_elems)
        return pl.CostEstimate(flops=flops, transcendentals=trans,
                               bytes_accessed=bytes_accessed)

    def forward(x, padded_params):
        batch = x.shape[0]
        b8 = _round_up(batch, _SUBLANE)
        bm = min(block_m, b8)                 # batch (M) block, multiple of 8
        b_pad = _round_up(b8, bm)
        num_blocks = b_pad // bm

        x_p = jnp.zeros((b_pad, in_pad), jnp.float32).at[:batch, :in_f].set(x)

        flat_inputs = [x_p]
        in_specs = [pl.BlockSpec((bm, in_pad), lambda i: (i, 0))]
        for (w_p, b_p) in padded_params:
            flat_inputs.extend((w_p, b_p))
            in_specs.append(pl.BlockSpec(w_p.shape, lambda i: (0, 0)))
            in_specs.append(pl.BlockSpec(b_p.shape, lambda i: (0, 0)))

        out_layer_ids = list(range(num_layers)) if return_all else [num_layers - 1]
        out_shapes = [jax.ShapeDtypeStruct((b_pad, out_pads[l]), jnp.float32)
                      for l in out_layer_ids]
        out_specs = [pl.BlockSpec((bm, out_pads[l]), lambda i: (i, 0))
                     for l in out_layer_ids]

        # VMEM-budget guard for the whole-layer-resident design.
        param_bytes = sum(w.size * 4 + b.size * 4 for w, b in padded_params)
        act_bytes = bm * in_pad * 4 + sum(bm * op * 4 for op in out_pads)
        vmem_needed = param_bytes + 2 * act_bytes + (1 << 20)  # 1 MiB margin
        cp_kwargs = dict(dimension_semantics=("parallel",))
        if vmem_needed > _DEFAULT_SCOPED_VMEM:
            # TODO(synk): beyond ~64 MiB (v7x physical VMEM) the whole-layer
            # resident weights must instead be K/N-blocked via BlockSpec
            # pipelining; not needed at these sizes.
            cp_kwargs["vmem_limit_bytes"] = int(min(vmem_needed, _VMEM_CEILING))

        outs = pl.pallas_call(
            functools.partial(_fused_mlp_kernel,
                              num_layers=num_layers, write_all=return_all),
            grid=(num_blocks,),
            out_shape=out_shapes,
            in_specs=in_specs,
            out_specs=out_specs,
            compiler_params=pltpu.CompilerParams(**cp_kwargs),
            cost_estimate=_cost(batch),
        )(*flat_inputs)

        if return_all:
            x_array = [x] + [o[:batch, :layer_sizes[l + 1]]
                             for l, o in enumerate(outs)]
            return x_array, x_array[-1]
        return outs[0][:batch, :layer_sizes[-1]]

    return jax.jit(forward)


def init_params(key, n_layers):
    """Deterministic init mimicking nn.Linear's default (uniform +/- 1/sqrt(fan_in))."""
    params = []
    for in_f, out_f in zip(n_layers, n_layers[1:]):
        key, kw, kb = jax.random.split(key, 3)
        bound = 1.0 / math.sqrt(in_f)
        w = jax.random.uniform(kw, (in_f, out_f), jnp.float32, -bound, bound)
        b = jax.random.uniform(kb, (out_f,), jnp.float32, -bound, bound)
        params.append((w, b))
    return params


if __name__ == "__main__":
    # Synthetic config consistent with the module: cf['n_layers'] is a list of
    # layer widths; pid/perc_lim etc. do not affect the forward pass.
    # TODO(synk): update_params (evolutionary mutation) is host-side RNG and
    # config bookkeeping, not part of the forward pass; not a kernel.
    n_layers = [8, 32, 32, 4]
    batch = 2

    key = jax.random.PRNGKey(0)
    key, kx = jax.random.split(key)
    x = jax.random.normal(kx, (batch, n_layers[0]), jnp.float32)

    params = init_params(key, n_layers)
    padded_params = pad_params(params)          # pad ONCE at init, reuse

    forward = make_my_ann_forward(n_layers)     # jitted wrapper
    x_array, out = forward(x, padded_params)
    jax.block_until_ready(out)
    for a in x_array:
        jax.block_until_ready(a)

    # Plain-JAX reference of the same math.
    ref = x
    ref_array = [x]
    for l, (w, b) in enumerate(params):
        ref = ref @ w + b
        if l < len(params) - 1:
            ref = jnp.tanh(ref)
        ref_array.append(ref)

    assert jnp.allclose(out, ref, atol=1e-5), "mismatch vs reference (final)"
    for got, want in zip(x_array, ref_array):
        assert got.shape == want.shape
        assert jnp.allclose(got, want, atol=1e-5), "mismatch vs reference (hidden)"
    assert out.shape == (batch, n_layers[-1])
    assert len(x_array) == len(n_layers)

    # Exercise the M-blocked grid path (multiple batch blocks) and the
    # final-output-only variant on a larger batch.
    big_batch = 320
    key, kb = jax.random.split(key)
    xb = jax.random.normal(kb, (big_batch, n_layers[0]), jnp.float32)
    fwd_final_only = make_my_ann_forward(n_layers, block_m=128, return_all=False)
    out_big = fwd_final_only(xb, padded_params)
    jax.block_until_ready(out_big)

    ref_b = xb
    for l, (w, b) in enumerate(params):
        ref_b = ref_b @ w + b
        if l < len(params) - 1:
            ref_b = jnp.tanh(ref_b)
    assert out_big.shape == (big_batch, n_layers[-1])
    assert jnp.allclose(out_big, ref_b, atol=1e-5), "mismatch vs reference (big batch)"

    print("KERNEL_OK")
</pallas_src>

<mosaic_0001>
module attributes {stable_mosaic.version = 11 : i64} {
  func.func @_fused_mlp_kernel(%arg0: i32, %arg1: memref<8x128xf32, #tpu.memory_space<vmem>>, %arg2: memref<128x128xf32, #tpu.memory_space<vmem>>, %arg3: memref<1x128xf32, #tpu.memory_space<vmem>>, %arg4: memref<128x128xf32, #tpu.memory_space<vmem>>, %arg5: memref<1x128xf32, #tpu.memory_space<vmem>>, %arg6: memref<128x128xf32, #tpu.memory_space<vmem>>, %arg7: memref<1x128xf32, #tpu.memory_space<vmem>>, %arg8: memref<8x128xf32, #tpu.memory_space<vmem>>, %arg9: memref<8x128xf32, #tpu.memory_space<vmem>>, %arg10: memref<8x128xf32, #tpu.memory_space<vmem>>) attributes {dimension_semantics = [#tpu.dimension_semantics<parallel>], iteration_bounds = array<i64: 1>, scalar_prefetch = 0 : i64, scratch_operands = 0 : i64, tpu.core_type = #tpu.core_type<tc>, window_params = [{transform_indices = @transform_0, window_bounds = array<i64: 8, 128>}, {pipeline_mode = #tpu.pipeline_mode<synchronous>, transform_indices = @transform_1, window_bounds = array<i64: 128, 128>}, {pipeline_mode = #tpu.pipeline_mode<synchronous>, transform_indices = @transform_2, window_bounds = array<i64: 1, 128>}, {pipeline_mode = #tpu.pipeline_mode<synchronous>, transform_indices = @transform_3, window_bounds = array<i64: 128, 128>}, {pipeline_mode = #tpu.pipeline_mode<synchronous>, transform_indices = @transform_4, window_bounds = array<i64: 1, 128>}, {pipeline_mode = #tpu.pipeline_mode<synchronous>, transform_indices = @transform_5, window_bounds = array<i64: 128, 128>}, {pipeline_mode = #tpu.pipeline_mode<synchronous>, transform_indices = @transform_6, window_bounds = array<i64: 1, 128>}, {transform_indices = @transform_7, window_bounds = array<i64: 8, 128>}, {transform_indices = @transform_8, window_bounds = array<i64: 8, 128>}, {transform_indices = @transform_9, window_bounds = array<i64: 8, 128>}]} {
    %c0 = arith.constant 0 : index
    %c0_0 = arith.constant 0 : index
    %0 = vector.load %arg1[%c0, %c0_0] : memref<8x128xf32, #tpu.memory_space<vmem>>, vector<8x128xf32>
    %c0_1 = arith.constant 0 : index
    %c0_2 = arith.constant 0 : index
    %1 = vector.load %arg2[%c0_1, %c0_2] : memref<128x128xf32, #tpu.memory_space<vmem>>, vector<128x128xf32>
    %c0_3 = arith.constant 0 : index
    %c0_4 = arith.constant 0 : index
    %2 = vector.load %arg3[%c0_3, %c0_4] : memref<1x128xf32, #tpu.memory_space<vmem>>, vector<1x128xf32>
    %cst = arith.constant dense<0.000000e+00> : vector<8x128xf32>
    %3 = tpu.matmul %0, %1, %cst {dimension_numbers = #tpu.dot_dimension_numbers<[1], [0], [0], [1], [0, 0, 1, 1], [], []>} : vector<8x128xf32>, vector<128x128xf32>, vector<8x128xf32> -> vector<8x128xf32>
    %4 = vector.broadcast %2 : vector<1x128xf32> to vector<8x128xf32>
    %5 = arith.addf %3, %4 : vector<8x128xf32>
    %6 = math.tanh %5 : vector<8x128xf32>
    %c0_5 = arith.constant 0 : index
    %c0_6 = arith.constant 0 : index
    %7 = vector.load %arg8[%c0_5, %c0_6] : memref<8x128xf32, #tpu.memory_space<vmem>>, vector<8x128xf32>
    tpu.vector_store %arg8[%c0_5, %c0_6], %6 {strides = array<i32>} : memref<8x128xf32, #tpu.memory_space<vmem>>, vector<8x128xf32>,
    %c0_7 = arith.constant 0 : index
    %c0_8 = arith.constant 0 : index
    %8 = vector.load %arg4[%c0_7, %c0_8] : memref<128x128xf32, #tpu.memory_space<vmem>>, vector<128x128xf32>
    %c0_9 = arith.constant 0 : index
    %c0_10 = arith.constant 0 : index
    %9 = vector.load %arg5[%c0_9, %c0_10] : memref<1x128xf32, #tpu.memory_space<vmem>>, vector<1x128xf32>
    %cst_11 = arith.constant dense<0.000000e+00> : vector<8x128xf32>
    %10 = tpu.matmul %6, %8, %cst_11 {dimension_numbers = #tpu.dot_dimension_numbers<[1], [0], [0], [1], [0, 0, 1, 1], [], []>} : vector<8x128xf32>, vector<128x128xf32>, vector<8x128xf32> -> vector<8x128xf32>
    %11 = vector.broadcast %9 : vector<1x128xf32> to vector<8x128xf32>
    %12 = arith.addf %10, %11 : vector<8x128xf32>
    %13 = math.tanh %12 : vector<8x128xf32>
    %c0_12 = arith.constant 0 : index
    %c0_13 = arith.constant 0 : index
    %14 = vector.load %arg9[%c0_12, %c0_13] : memref<8x128xf32, #tpu.memory_space<vmem>>, vector<8x128xf32>
    tpu.vector_store %arg9[%c0_12, %c0_13], %13 {strides = array<i32>} : memref<8x128xf32, #tpu.memory_space<vmem>>, vector<8x128xf32>,
    %c0_14 = arith.constant 0 : index
    %c0_15 = arith.constant 0 : index
    %15 = vector.load %arg6[%c0_14, %c0_15] : memref<128x128xf32, #tpu.memory_space<vmem>>, vector<128x128xf32>
    %c0_16 = arith.constant 0 : index
    %c0_17 = arith.constant 0 : index
    %16 = vector.load %arg7[%c0_16, %c0_17] : memref<1x128xf32, #tpu.memory_space<vmem>>, vector<1x128xf32>
    %cst_18 = arith.constant dense<0.000000e+00> : vector<8x128xf32>
    %17 = tpu.matmul %13, %15, %cst_18 {dimension_numbers = #tpu.dot_dimension_numbers<[1], [0], [0], [1], [0, 0, 1, 1], [], []>} : vector<8x128xf32>, vector<128x128xf32>, vector<8x128xf32> -> vector<8x128xf32>
    %18 = vector.broadcast %16 : vector<1x128xf32> to vector<8x128xf32>
    %19 = arith.addf %17, %18 : vector<8x128xf32>
    %c0_19 = arith.constant 0 : index
    %c0_20 = arith.constant 0 : index
    %20 = vector.load %arg10[%c0_19, %c0_20] : memref<8x128xf32, #tpu.memory_space<vmem>>, vector<8x128xf32>
    tpu.vector_store %arg10[%c0_19, %c0_20], %19 {strides = array<i32>} : memref<8x128xf32, #tpu.memory_space<vmem>>, vector<8x128xf32>,
    return
  }
  func.func @transform_0(%arg0: i32) -> (i32, i32) {
    %c0_i32 = arith.constant 0 : i32
    %c0_i32_0 = arith.constant 0 : i32
    return %arg0, %c0_i32 : i32, i32
  }
  func.func @transform_1(%arg0: i32) -> (i32, i32) {
    %c0_i32 = arith.constant 0 : i32
    %c0_i32_0 = arith.constant 0 : i32
    %c0_i32_1 = arith.constant 0 : i32
    return %c0_i32, %c0_i32_0 : i32, i32
  }
  func.func @transform_2(%arg0: i32) -> (i32, i32) {
    %c0_i32 = arith.constant 0 : i32
    %c0_i32_0 = arith.constant 0 : i32
    %c0_i32_1 = arith.constant 0 : i32
    return %c0_i32, %c0_i32_0 : i32, i32
  }
  func.func @transform_3(%arg0: i32) -> (i32, i32) {
    %c0_i32 = arith.constant 0 : i32
    %c0_i32_0 = arith.constant 0 : i32
    %c0_i32_1 = arith.constant 0 : i32
    return %c0_i32, %c0_i32_0 : i32, i32
  }
  func.func @transform_4(%arg0: i32) -> (i32, i32) {
    %c0_i32 = arith.constant 0 : i32
    %c0_i32_0 = arith.constant 0 : i32
    %c0_i32_1 = arith.constant 0 : i32
    return %c0_i32, %c0_i32_0 : i32, i32
  }
  func.func @transform_5(%arg0: i32) -> (i32, i32) {
    %c0_i32 = arith.constant 0 : i32
    %c0_i32_0 = arith.constant 0 : i32
    %c0_i32_1 = arith.constant 0 : i32
    return %c0_i32, %c0_i32_0 : i32, i32
  }
  func.func @transform_6(%arg0: i32) -> (i32, i32) {
    %c0_i32 = arith.constant 0 : i32
    %c0_i32_0 = arith.constant 0 : i32
    %c0_i32_1 = arith.constant 0 : i32
    return %c0_i32, %c0_i32_0 : i32, i32
  }
  func.func @transform_7(%arg0: i32) -> (i32, i32) {
    %c0_i32 = arith.constant 0 : i32
    %c0_i32_0 = arith.constant 0 : i32
    return %arg0, %c0_i32 : i32, i32
  }
  func.func @transform_8(%arg0: i32) -> (i32, i32) {
    %c0_i32 = arith.constant 0 : i32
    %c0_i32_0 = arith.constant 0 : i32
    return %arg0, %c0_i32 : i32, i32
  }
  func.func @transform_9(%arg0: i32) -> (i32, i32) {
    %c0_i32 = arith.constant 0 : i32
    %c0_i32_0 = arith.constant 0 : i32
    return %arg0, %c0_i32 : i32, i32
  }
}

</mosaic_0001>

<bundles_post_ra>
// kernel: forward.1
= control target key start
LH: loop header
LB: loop body
LE: loop exit
PB: predicated region body
PF: predicated region fallthrough
CT: control target
= control target key end

     0   :  { %15 = vsyncpa [#allocation3], 0  ;;  %s843_s0 = inlined_call_operand.vmem [shape: f32[8,128], index: 0, kind: input, shape index: {}]   ;;  %s844_s1 = inlined_call_operand.hbm [shape: f32[128,128], index: 1, kind: input, shape index: {}]   ;;  %s845_s2 = inlined_call_operand.vmem [shape: f32[1,128], index: 2, kind: input, shape index: {}]   ;;  %s846_s3 = inlined_call_operand.hbm [shape: f32[128,128], index: 3, kind: input, shape index: {}]   ;;  %s847_s4 = inlined_call_operand.vmem [shape: f32[1,128], index: 4, kind: input, shape index: {}]   ;;  %s848_s5 = inlined_call_operand.hbm [shape: f32[128,128], index: 5, kind: input, shape index: {}]   ;;  %s849_s6 = inlined_call_operand.vmem [shape: f32[1,128], index: 6, kind: input, shape index: {}]   ;;  %s850_s7 = inlined_call_operand.vmem [shape: f32[8,128], index: 7, kind: output, shape index: {0}]   ;;  %s851_s8 = inlined_call_operand.vmem [shape: f32[8,128], index: 8, kind: output, shape index: {1}]   ;;  %s852_s9 = inlined_call_operand.vmem [shape: f32[8,128], index: 9, kind: output, shape index: {2}]  }
   0x1   :  { %16 = vsyncpa [#allocation5], 0  ;;  %s682_s30 = smov [#allocation4]   ;;  %s683_s11 = smov [#allocation2]  }
   0x2   :  { %s38_s10 = sshll.u32 %s682_s30, 4  ;;  %s24_s12 = sshll.u32 %s683_s11, 4  ;;  %s39_s10 = int_to_ptr.vmem [resolvable:$true] %s38_s10  ;;  %s740_s12 = int_to_ptr.vmem [resolvable:$true] %s24_s12 }
   0x3   :  { %s612_s15 = scalar_lea.hbm %s846_s3, 2048 }
   0x4   :  { %p613_p0 = scmp.ne.s32.totalorder %s846_s3, %s612_s15  ;;  %p616_p1 = scmp.lt.u32.totalorder %s612_s15, %s846_s3 }
   0x6   :  { %p618_p2 = pnand %p616_p1, %p613_p0 }
   0x8   :  { %621 = shalt.err (!%p618_p2)
}
   0x9   :  { %s622_s20 = scalar_lea.vmem %s39_s10, 2048  ;;  %p627_p4 = scmp.lt.s32.totalorder %s39_s10, %s39_s10 }
   0xa   :  { %p623_p3 = scmp.ne.s32.totalorder %s39_s10, %s622_s20  ;;  %p628_p5 = scmp.lt.s32.totalorder %s622_s20, %s622_s20 }
   0xc   :  { %p629_p6 = por %p628_p5, %p627_p4 }
   0xe   :  { %p630_p7 = pnand %p629_p6, %p623_p3 }
  0x10   :  { %633 = shalt.err (!%p630_p7)
}
  0x11   :  { %s684_s21 = smov 128   ;;  %s685_s22 = smov 8  }
  0x12   :  { %44 = dma.hbm_to_vmem [thread:$0]  %s846_s3, 2048, %s39_s10, [#allocation5], %s684_s21, %s684_s21, %s685_s22  }
  0x13   :  { %s634_s27 = scalar_lea.hbm %s844_s1, 2048 }
  0x14   :  { %p635_p8 = scmp.ne.s32.totalorder %s844_s1, %s634_s27  ;;  %p638_p9 = scmp.lt.u32.totalorder %s634_s27, %s844_s1 }
  0x16   :  { %p640_p10 = pnand %p638_p9, %p635_p8 }
  0x18   :  { %643 = shalt.err (!%p640_p10)
}
  0x19   :  { %s644_s13 = scalar_lea.vmem %s740_s12, 2048  ;;  %p649_p12 = scmp.lt.s32.totalorder %s740_s12, %s740_s12 }
  0x1a   :  { %p645_p11 = scmp.ne.s32.totalorder %s740_s12, %s644_s13  ;;  %p650_p13 = scmp.lt.s32.totalorder %s644_s13, %s644_s13 }
  0x1c   :  { %p651_p0 = por %p650_p13, %p649_p12 }
  0x1e   :  { %p652_p1 = pnand %p651_p0, %p645_p11 }
  0x20   :  { %655 = shalt.err (!%p652_p1)
}
  0x21   :  { %30 = dma.hbm_to_vmem [thread:$0]  %s844_s1, 2048, %s740_s12, [#allocation3], %s684_s21, %s684_s21, %s685_s22  }
  0x22   :  { %s686_s14 = smov [#allocation6]   ;;  %s656_s18 = scalar_lea.hbm %s848_s5, 2048 }
  0x23   :  { %s52_s15 = sshll.u32 %s686_s14, 4  ;;  %p657_p2 = scmp.ne.s32.totalorder %s848_s5, %s656_s18  ;;  %s53_s15 = int_to_ptr.vmem [resolvable:$true] %s52_s15 }
  0x24   :  { %p660_p3 = scmp.lt.u32.totalorder %s656_s18, %s848_s5 }
  0x26   :  { %p662_p4 = pnand %p660_p3, %p657_p2 }
  0x28   :  { %665 = shalt.err (!%p662_p4)
}
  0x29   :  { %s666_s25 = scalar_lea.vmem %s53_s15, 2048  ;;  %p671_p6 = scmp.lt.s32.totalorder %s53_s15, %s53_s15 }
  0x2a   :  { %p667_p5 = scmp.ne.s32.totalorder %s53_s15, %s666_s25  ;;  %p672_p7 = scmp.lt.s32.totalorder %s666_s25, %s666_s25 }
  0x2c   :  { %p673_p8 = por %p672_p7, %p671_p6 }
  0x2e   :  { %p674_p9 = pnand %p673_p8, %p667_p5 }
  0x30   :  { %677 = shalt.err (!%p674_p9)
}
  0x31   :  { %58 = dma.hbm_to_vmem [thread:$0]  %s848_s5, 2048, %s53_s15, [#allocation5], %s684_s21, %s684_s21, %s685_s22  }
  0x32   :  { %678 = dma.done.wait [#allocation3], 2048  }
  0x33   :  { %679 = vsyncadd [#allocation3], 4294965248 }
  0x34   :  { %680 = dma.done.wait [#allocation5], 4096  }
  0x35   :  { %681 = vsyncadd [#allocation5], 4294963200  ;;  %v687_v0 = vmov 0.0|0.0   ;;  %vm688_vm0 = vmmov 0   ;;  %v689_v1 = vmov 0.0   ;;  %v71_v2 = vld [vmem:[#allocation2] sm:$0xff] }
  0x36   :  { %528 = vmatprep.subr.bf16.mxu0 %v687_v0  ;;  %455 = vmatprep.mubr.msk.f32.mxu0 %vm688_vm0, %v689_v1  ;;  %v72_v3 = vld [vmem:[#allocation2 + $0x8] sm:$0xff]  ;;  %v73_v4 = vld [vmem:[#allocation2 + $0x10] sm:$0xff]  ;;  %v74_v6 = vld [vmem:[#allocation2 + $0x18] sm:$0xff] }
  0x37   :  { %552 = vmatprep.subr.bf16.mxu1 %v687_v0  ;;  %490 = vmatprep.mubr.msk.f32.mxu1 %vm688_vm0, %v689_v1  ;;  %v529_v5 = vpack.c.bf16 %v72_v3, %v71_v2  ;;  %v532_v7 = vpack.c.bf16 %v74_v6, %v73_v4  ;;  %v75_v8 = vld [vmem:[#allocation2 + $0x20] sm:$0xff]  ;;  %v76_v9 = vld [vmem:[#allocation2 + $0x28] sm:$0xff]  ;;  %v168_v12 = vld [vmem:[#allocation4 + $0x10] sm:$0xff] }
  0x38   :  { %v166_v10 = vld [vmem:[#allocation4] sm:$0xff]  ;;  %v167_v11 = vld [vmem:[#allocation4 + $0x8] sm:$0xff]  ;;  %v169_v13 = vld [vmem:[#allocation4 + $0x18] sm:$0xff]  ;;  %v535_v14 = vpack.c.bf16 %v76_v9, %v75_v8 }
  0x39   :  { %530 = vmatpush3.bf16.msra.mxu0 %v529_v5  ;;  %v553_v15 = vpack.c.bf16 %v167_v11, %v166_v10  ;;  %v77_v16 = vld [vmem:[#allocation2 + $0x30] sm:$0xff]  ;;  %v78_v17 = vld [vmem:[#allocation2 + $0x38] sm:$0xff]  ;;  %v556_v18 = vpack.c.bf16 %v169_v13, %v168_v12  ;;  %v170_v19 = vld [vmem:[#allocation4 + $0x20] sm:$0xff] }
  0x3a   :  { %531 = vmatprep.subr.bf16.mxu0 %v687_v0  ;;  %v171_v20 = vld [vmem:[#allocation4 + $0x28] sm:$0xff]  ;;  %v538_v21 = vpack.c.bf16 %v78_v17, %v77_v16  ;;  %v79_v22 = vld [vmem:[#allocation2 + $0x40] sm:$0xff]  ;;  %v172_v25 = vld [vmem:[#allocation4 + $0x30] sm:$0xff] }
  0x3b   :  { %554 = vmatpush3.bf16.msra.mxu1 %v553_v15  ;;  %v80_v23 = vld [vmem:[#allocation2 + $0x48] sm:$0xff]  ;;  %v559_v24 = vpack.c.bf16 %v171_v20, %v170_v19  ;;  %v173_v26 = vld [vmem:[#allocation4 + $0x38] sm:$0xff]  ;;  %v81_v28 = vld [vmem:[#allocation2 + $0x50] sm:$0xff] }
  0x3c   :  { %555 = vmatprep.subr.bf16.mxu1 %v687_v0  ;;  %v541_v27 = vpack.c.bf16 %v80_v23, %v79_v22  ;;  %v82_v29 = vld [vmem:[#allocation2 + $0x58] sm:$0xff]  ;;  %v562_v30 = vpack.c.bf16 %v173_v26, %v172_v25  ;;  %v174_v31 = vld [vmem:[#allocation4 + $0x40] sm:$0xff]  ;;  %v175_v32 = vld [vmem:[#allocation4 + $0x48] sm:$0xff] }
  0x3d   :  { %533 = vmatpush3.bf16.msra.mxu0 %v532_v7  ;;  %v544_v33 = vpack.c.bf16 %v82_v29, %v81_v28  ;;  %v83_v34 = vld [vmem:[#allocation2 + $0x60] sm:$0xff]  ;;  %v84_v35 = vld [vmem:[#allocation2 + $0x68] sm:$0xff]  ;;  %v565_v36 = vpack.c.bf16 %v175_v32, %v174_v31  ;;  %v85_v38 = vld [vmem:[#allocation2 + $0x70] sm:$0xff] }
  0x3e   :  { %534 = vmatprep.subr.bf16.mxu0 %v687_v0  ;;  %v547_v37 = vpack.c.bf16 %v84_v35, %v83_v34  ;;  %v86_v39 = vld [vmem:[#allocation2 + $0x78] sm:$0xff]  ;;  %v70_v41 = vld [vmem:[%s843_s0] sm:$0xff]  ;;  %v176_v42 = vld [vmem:[#allocation4 + $0x50] sm:$0xff] }
  0x3f   :  { %557 = vmatpush3.bf16.msra.mxu1 %v556_v18  ;;  %v550_v40 = vpack.c.bf16 %v86_v39, %v85_v38  ;;  %v177_v43 = vld [vmem:[#allocation4 + $0x58] sm:$0xff]  ;;  %v178_v45 = vld [vmem:[#allocation4 + $0x60] sm:$0xff]  ;;  %v179_v46 = vld [vmem:[#allocation4 + $0x68] sm:$0xff] }
  0x40   :  { %558 = vmatprep.subr.bf16.mxu1 %v687_v0  ;;  %v568_v44 = vpack.c.bf16 %v177_v43, %v176_v42  ;;  %v571_v47 = vpack.c.bf16 %v179_v46, %v178_v45  ;;  %v180_v48 = vld [vmem:[#allocation4 + $0x70] sm:$0xff]  ;;  %v181_v49 = vld [vmem:[#allocation4 + $0x78] sm:$0xff]  ;;  %v261_v51 = vld [vmem:[#allocation6] sm:$0xff] }
  0x41   :  { %536 = vmatpush3.bf16.msra.mxu0 %v535_v14  ;;  %v574_v50 = vpack.c.bf16 %v181_v49, %v180_v48  ;;  %v262_v52 = vld [vmem:[#allocation6 + $0x8] sm:$0xff]  ;;  %v263_v53 = vld [vmem:[#allocation6 + $0x10] sm:$0xff]  ;;  %v264_v55 = vld [vmem:[#allocation6 + $0x18] sm:$0xff] }
  0x42   :  { %537 = vmatprep.subr.bf16.mxu0 %v687_v0  ;;  %v577_v54 = vpack.c.bf16 %v262_v52, %v261_v51  ;;  %v580_v56 = vpack.c.bf16 %v264_v55, %v263_v53  ;;  %v265_v57 = vld [vmem:[#allocation6 + $0x20] sm:$0xff]  ;;  %v266_v58 = vld [vmem:[#allocation6 + $0x28] sm:$0xff]  ;;  %v267_v60 = vld [vmem:[#allocation6 + $0x30] sm:$0xff] }
  0x43   :  { %560 = vmatpush3.bf16.msra.mxu1 %v559_v24  ;;  %v583_v59 = vpack.c.bf16 %v266_v58, %v265_v57  ;;  %v268_v61 = vld [vmem:[#allocation6 + $0x38] sm:$0xff]  ;;  %v269_v63 = vld [vmem:[#allocation6 + $0x40] sm:$0xff]  ;;  %v271_v8 = vld [vmem:[#allocation6 + $0x50] sm:$0xff] }
  0x44   :  { %561 = vmatprep.subr.bf16.mxu1 %v687_v0  ;;  %v586_v62 = vpack.c.bf16 %v268_v61, %v267_v60  ;;  %v369_v3 = vld [vmem:[%s845_s2] ss:$0 sm:$0xff]  ;;  %v272_v9 = vld [vmem:[#allocation6 + $0x58] sm:$0xff]  ;;  %v274_v12 = vld [vmem:[#allocation6 + $0x68] sm:$0xff] }
  0x45   :  { %539 = vmatpush3.bf16.msra.mxu0 %v538_v21  ;;  %v592_v10 = vpack.c.bf16 %v272_v9, %v271_v8  ;;  %v273_v11 = vld [vmem:[#allocation6 + $0x60] sm:$0xff]  ;;  %v275_v14 = vld [vmem:[#allocation6 + $0x70] sm:$0xff]  ;;  %v276_v15 = vld [vmem:[#allocation6 + $0x78] sm:$0xff] }
  0x46   :  { %540 = vmatprep.subr.bf16.mxu0 %v687_v0  ;;  %v595_v13 = vpack.c.bf16 %v274_v12, %v273_v11  ;;  %v598_v16 = vpack.c.bf16 %v276_v15, %v275_v14  ;;  %v370_v17 = vld [vmem:[%s847_s4] ss:$0 sm:$0xff] }
  0x47   :  { %563 = vmatpush3.bf16.msra.mxu1 %v562_v30 }
  0x48   :  { %564 = vmatprep.subr.bf16.mxu1 %v687_v0 }
  0x49   :  { %542 = vmatpush3.bf16.msra.mxu0 %v541_v27 }
  0x4a   :  { %543 = vmatprep.subr.bf16.mxu0 %v687_v0 }
  0x4b   :  { %566 = vmatpush3.bf16.msra.mxu1 %v565_v36 }
  0x4c   :  { %567 = vmatprep.subr.bf16.mxu1 %v687_v0 }
  0x4d   :  { %545 = vmatpush3.bf16.msra.mxu0 %v544_v33 }
  0x4e   :  { %546 = vmatprep.subr.bf16.mxu0 %v687_v0 }
  0x4f   :  { %569 = vmatpush3.bf16.msra.mxu1 %v568_v44 }
  0x50   :  { %570 = vmatprep.subr.bf16.mxu1 %v687_v0 }
  0x51   :  { %548 = vmatpush3.bf16.msra.mxu0 %v547_v37 }
  0x52   :  { %549 = vmatprep.subr.bf16.mxu0 %v687_v0 }
  0x53   :  { %572 = vmatpush3.bf16.msra.mxu1 %v571_v47 }
  0x54   :  { %573 = vmatprep.subr.bf16.mxu1 %v687_v0 }
  0x55   :  { %551 = vmatpush3.bf16.msra.mxu0 %v550_v40 }
  0x56   :  { %576 = vmatprep.subr.bf16.mxu0 %v687_v0 }
  0x57   :  { %575 = vmatpush3.bf16.msra.mxu1 %v574_v50 }
  0x58   :  { %456 = vmatmul.mubr.f32.vlgmr.msra.gmra.mrb[0].mxu0 %v70_v41 }
  0x59   :  { %525 = vmatprep.mubr.msk.f32.mxu0 %vm688_vm0, %v689_v1  ;;  %578 = vmatpush3.bf16.msra.mxu0 %v577_v54  ;;  %v270_v1 = vld [vmem:[#allocation6 + $0x48] sm:$0xff] }
  0x5a   :  { %579 = vmatprep.subr.bf16.mxu0 %v687_v0  ;;  %v589_v2 = vpack.c.bf16 %v270_v1, %v269_v63 }
  0x5d   :  { %581 = vmatpush3.bf16.msra.mxu0 %v580_v56 }
  0x5e   :  { %582 = vmatprep.subr.bf16.mxu0 %v687_v0 }
  0x61   :  { %584 = vmatpush3.bf16.msra.mxu0 %v583_v59 }
  0x62   :  { %585 = vmatprep.subr.bf16.mxu0 %v687_v0 }
  0x65   :  { %587 = vmatpush3.bf16.msra.mxu0 %v586_v62 }
  0x66   :  { %588 = vmatprep.subr.bf16.mxu0 %v687_v0 }
  0x69   :  { %590 = vmatpush3.bf16.msra.mxu0 %v589_v2 }
  0x6a   :  { %591 = vmatprep.subr.bf16.mxu0 %v687_v0 }
  0x6d   :  { %593 = vmatpush3.bf16.msra.mxu0 %v592_v10 }
  0x6e   :  { %594 = vmatprep.subr.bf16.mxu0 %v687_v0 }
  0x71   :  { %596 = vmatpush3.bf16.msra.mxu0 %v595_v13 }
  0x72   :  { %597 = vmatprep.subr.bf16.mxu0 %v687_v0  ;;  %v371_v0 = vld [vmem:[%s849_s6] ss:$0 sm:$0xff] }
  0x75   :  { %599 = vmatpush3.bf16.msra.mxu0 %v598_v16 }
 0x12b   :  { %v160_v4 = vpop.f32.mrb[0].mxu0 }
 0x12c   :  { %v161_v5 = vadd.f32 %v369_v3, %v160_v4  ;;  %v457_v6 = vpop.f32.mrb[1].mxu0 }
 0x12e   :  { %608 = vtanh.f32 %v161_v5 }
 0x138   :  { %v609_v7 = vpop.eup %608 }
 0x139   :  { %165 = vst [vmem:[%s850_s7] sm:$0xff] %v609_v7  ;;  %491 = vmatmul.mubr.f32.vlgmr.msra.gmra.mrb[0].mxu1 %v609_v7 }
 0x20c   :  { %v255_v18 = vpop.f32.mrb[0].mxu1 }
 0x20d   :  { %v256_v19 = vadd.f32 %v370_v17, %v255_v18  ;;  %v492_v20 = vpop.f32.mrb[1].mxu1 }
 0x20f   :  { %610 = vtanh.f32 %v256_v19 }
 0x219   :  { %v611_v21 = vpop.eup %610 }
 0x21a   :  { %260 = vst [vmem:[%s851_s8] sm:$0xff] %v611_v21  ;;  %526 = vmatmul.mubr.f32.vlgmr.msra.gmra.mrb[2].mxu0 %v611_v21 }
 0x2ed   :  { %v350_v22 = vpop.f32.mrb[2].mxu0 }
 0x2ee   :  { %v351_v23 = vadd.f32 %v371_v0, %v350_v22  ;;  %v527_v24 = vpop.f32.mrb[3].mxu0 }
 0x2f0   :  { %354 = vst [vmem:[%s852_s9] sm:$0xff] %v351_v23 }
 0x2f1   :  { %367 = vsyncpa [#allocation3], 1 }
 0x2f2   :  { %368 = vsyncpa [#allocation5], 1 }

</bundles_post_ra>
